<compile_context>
chip_gen: v6e
topology: v6e:2x2x1
jax: 0.10.0
libtpu: 0.0.40
codegen_flags: <defaults>
</compile_context>

<pallas_src>
import functools
import math

import jax
import jax.numpy as jnp
from jax.experimental import pallas as pl
from jax.experimental.pallas import tpu as pltpu


_VMEM_LIMIT = 32 * 1024 * 1024  # explicit scoped-VMEM budget (v5e default is 16 MiB)


# ----------------------------- Pallas kernels -----------------------------

def _graph_prep_kernel(adj_ref, x_ref, wp_ref, agc_in_ref, score_ref, dmean_ref):
    """norm_lap @ x without materializing norm_lap, TopK score, adj col-mean."""
    A = adj_ref[...]
    x = x_ref[...]
    n = A.shape[0]
    # A is symmetric (adj + adj.T), so colsum == rowsum: one reduction only.
    d = jnp.sum(A, axis=1, keepdims=True)                       # [N, 1]
    # guard: isolated nodes would give inf/NaN in the torch reference too;
    # zero keeps them finite (identical for any graph without degree-0 nodes).
    rsq = jnp.where(d > 0.0, jax.lax.rsqrt(jnp.maximum(d, 1e-30)), 0.0)
    dmean_ref[...] = d * (1.0 / n)                               # mean(adj, dim=0) as column
    w = wp_ref[...]                                              # [1, L]
    inv_norm = jax.lax.rsqrt(jnp.sum(w * w))
    score_ref[...] = jnp.tanh(jnp.sum(x * w, axis=1, keepdims=True) * inv_norm)
    # (I - D^-1/2 A D^-1/2) @ x  ==  x - rsq * (A @ (rsq * x))
    agc_in_ref[...] = x - rsq * jnp.dot(A, rsq * x,
                                        preferred_element_type=jnp.float32)


def _core_kernel(xq_ref, pq_ref, agcin_ref, dmean_ref,
                 xw1_ref, xb1_ref, xw2_ref, xb2_ref, xg_ref, xbe_ref,
                 sw1_ref, sb1_ref, sw2_ref, sb2_ref, sg_ref, sbe_ref,
                 aw1_ref, ab1_ref, aw2_ref, ab2_ref,
                 ew1_ref, eb1_ref, ew2_ref, eb2_ref,
                 fw1_ref, fb1_ref, fw2_ref, fb2_ref,
                 s1wl_ref, s1bl_ref, s1wr_ref,
                 s2wl_ref, s2bl_ref, s2wr_ref,
                 asn_ref, bb_ref, ysup_ref, ycoarse_ref, *, dts):
    """repr nets + agc MLP + softmax assignment + backbone + fused ODE."""
    N, L = xq_ref.shape

    # ---- repr nets: Linear(1,H)+tanh -> Linear(H,H)+relu -> LayerNorm ----
    # Built block-by-block along lanes so the result is already the raw
    # [num_rows, L*ag] reinterpretation torch produces (lane-dense, in VMEM).
    def repr_blocks(xq, w1, b1, w2, b2, g, be):
        blocks = []
        for j in range(xq.shape[1]):
            h = jnp.tanh(xq[:, j:j + 1] * w1 + b1)               # VPU broadcast
            h = jnp.maximum(
                jnp.dot(h, w2, preferred_element_type=jnp.float32) + b2, 0.0)
            mu = jnp.mean(h, axis=-1, keepdims=True)
            var = jnp.mean((h - mu) ** 2, axis=-1, keepdims=True)
            blocks.append((h - mu) * jax.lax.rsqrt(var + 1e-5) * g + be)
        return jnp.concatenate(blocks, axis=-1)                   # [M, L*ag]

    rn = repr_blocks(xq_ref[...], xw1_ref[...], xb1_ref[...], xw2_ref[...],
                     xb2_ref[...], xg_ref[...], xbe_ref[...])     # [N, L*ag]
    rs = repr_blocks(pq_ref[...], sw1_ref[...], sb1_ref[...], sw2_ref[...],
                     sb2_ref[...], sg_ref[...], sbe_ref[...])     # [S, L*ag]

    # ---- agc MLP (pointwise): Linear(1,H)+ReLU -> Linear(H,1), then tanh ----
    agcin = agcin_ref[...]                                        # [N, L]
    aw1 = aw1_ref[...]; ab1 = ab1_ref[...]
    aw2 = aw2_ref[...]; ab2 = ab2_ref[...]
    lane = jax.lax.broadcasted_iota(jnp.int32, (1, L), 1)
    agc = jnp.zeros((N, L), jnp.float32)
    for l in range(L):
        ha = jnp.maximum(agcin[:, l:l + 1] * aw1 + ab1, 0.0)      # [N, ag]
        col = jnp.tanh(jnp.sum(ha * aw2, axis=1, keepdims=True) + ab2)
        agc = agc + jnp.where(lane == l, col, 0.0)                # place column l

    # ---- similarity -> exact softmax (assignment feeds everything below) ----
    sim = jax.lax.dot_general(rn, rs, (((1,), (1,)), ((), ())),
                              preferred_element_type=jnp.float32)  # [N, S]
    m = jnp.max(sim, axis=-1, keepdims=True)
    e = jnp.exp(sim - m)
    asn = e / jnp.sum(e, axis=-1, keepdims=True)
    asn_ref[...] = asn

    # ---- rank-1 backbone: A^T @ (ones ⊗ colmean) @ A == colsum(A) ⊗ (colmean@A)
    ones_col = jnp.ones((N, 1), jnp.float32)
    colsum = jax.lax.dot_general(asn, ones_col, (((0,), (0,)), ((), ())),
                                 preferred_element_type=jnp.float32)  # [S, 1]
    v = jax.lax.dot_general(dmean_ref[...], asn, (((0,), (0,)), ((), ())),
                            preferred_element_type=jnp.float32)       # [1, S]
    bb = colsum * v
    bb_ref[...] = bb

    # ---- supernode embeddings: assignment^T @ agc_repr -> [S, L] ----
    se = jax.lax.dot_general(asn, agc, (((0,), (0,)), ((), ())),
                             preferred_element_type=jnp.float32)

    # ---- BackboneODE ----
    # degree-normalized mean-aggregation matrix (hoisted out of the loop)
    mask = jnp.where(bb != 0.0, 1.0, 0.0)
    indeg = jnp.sum(mask, axis=0, keepdims=True)
    nrm = mask / jnp.maximum(indeg, 1.0)                          # [S, S]

    # init_enc: Linear(L, oh)+ReLU -> Linear(oh, 1)
    h0 = jnp.maximum(
        jnp.dot(se, ew1_ref[...], preferred_element_type=jnp.float32)
        + eb1_ref[...], 0.0)
    y = jnp.sum(h0 * ew2_ref[...], axis=1, keepdims=True) + eb2_ref[...]  # [S,1]

    fw1 = fw1_ref[...]; fb1 = fb1_ref[...]; fw2 = fw2_ref[...]; fb2 = fb2_ref[...]
    s1wl = s1wl_ref[...]; s1bl = s1bl_ref[...]; s1wr = s1wr_ref[...]
    s2wl = s2wl_ref[...]; s2bl = s2bl_ref[...]; s2wr = s2wr_ref[...]

    # explicit-Euler steps, trajectory kept as a value; slab stored once.
    # TODO(synk): switch to lax.fori_loop(unroll=True) if horizon grows large.
    ys = [y]
    for dt in dts:
        # f(X): Linear(1, oh)+ReLU -> Linear(oh, 1)
        hf = jnp.maximum(y * fw1 + fb1, 0.0)
        x_self = jnp.sum(hf * fw2, axis=1, keepdims=True) + fb2
        # g(X): SAGEConv(1, oh)+ReLU -> SAGEConv(oh, 1), mean aggregation
        agg1 = jax.lax.dot_general(nrm, y, (((0,), (0,)), ((), ())),
                                   preferred_element_type=jnp.float32)
        h1 = jnp.maximum(agg1 * s1wl + s1bl + y * s1wr, 0.0)
        agg2 = jax.lax.dot_general(nrm, h1, (((0,), (0,)), ((), ())),
                                   preferred_element_type=jnp.float32)
        x_neigh = (jnp.sum(agg2 * s2wl, axis=1, keepdims=True) + s2bl
                   + jnp.sum(h1 * s2wr, axis=1, keepdims=True))
        d = jnp.clip(x_self + x_neigh, -1000.0, 1000.0)
        y = y + dt * d
        ys.append(y)

    ysup = jnp.concatenate(ys, axis=-1)                           # [S, horizon]
    ysup_ref[...] = ysup
    ycoarse_ref[...] = jnp.dot(asn, ysup, preferred_element_type=jnp.float32)


def _refiner_kernel(xc_ref, yc_ref, wx_ref, bx_ref, wy_ref, by_ref,
                    wo1a_ref, wo1b_ref, bo1_ref, wo2_ref, bo2_ref, out_ref):
    """All clusters in one grid-less call; concat-free Linear(2*sr, sr)."""
    kk = xc_ref.shape[0]
    for k in range(kk):                                  # small, static unroll
        xc = xc_ref[k]
        yc = yc_ref[k]
        hx = jnp.tanh(jnp.dot(xc, wx_ref[k],
                              preferred_element_type=jnp.float32) + bx_ref[k])
        hy = jnp.tanh(jnp.dot(yc, wy_ref[k],
                              preferred_element_type=jnp.float32) + by_ref[k])
        ho = jnp.tanh(jnp.dot(hx, wo1a_ref[k], preferred_element_type=jnp.float32)
                      + jnp.dot(hy, wo1b_ref[k], preferred_element_type=jnp.float32)
                      + bo1_ref[k])
        z = jnp.dot(ho, wo2_ref[k], preferred_element_type=jnp.float32) + bo2_ref[k]
        # sigmoid(z) == 0.5 * (tanh(z/2) + 1): single EUP op, no VALU divide
        out_ref[k] = 0.5 * (jnp.tanh(0.5 * z) + 1.0)


# ---------------------------- kernel wrappers ------------------------------

def pallas_graph_prep(adj, x, w_pool):
    N, L = x.shape
    f32 = jnp.float32
    return pl.pallas_call(
        _graph_prep_kernel,
        out_shape=(jax.ShapeDtypeStruct((N, L), f32),   # (I - D^-1/2 A D^-1/2) x
                   jax.ShapeDtypeStruct((N, 1), f32),   # pooling score
                   jax.ShapeDtypeStruct((N, 1), f32)),  # mean(adj, dim=0) column
        compiler_params=pltpu.CompilerParams(vmem_limit_bytes=_VMEM_LIMIT),
    )(adj.astype(f32), x.astype(f32), w_pool.reshape(1, L).astype(f32))


def pallas_core(xq, pq, agc_in, dmean, params, dts, cfg):
    """Fused repr nets + agc MLP + assignment + backbone + BackboneODE."""
    N, L = xq.shape
    S = pq.shape[0]
    ag = cfg["ag_hid_dim"]
    oh = cfg["ode_hid_dim"]
    horizon = len(dts) + 1
    f32 = jnp.float32
    px, ps, pa, po = (params["repr_x"], params["repr_super"],
                      params["agc"], params["ode"])
    args = (xq, pq, agc_in, dmean,
            px["w1"], px["b1"].reshape(1, ag), px["w2"], px["b2"].reshape(1, ag),
            px["ln_g"].reshape(1, ag), px["ln_b"].reshape(1, ag),
            ps["w1"], ps["b1"].reshape(1, ag), ps["w2"], ps["b2"].reshape(1, ag),
            ps["ln_g"].reshape(1, ag), ps["ln_b"].reshape(1, ag),
            pa["w1"], pa["b1"].reshape(1, ag), pa["w2"].reshape(1, ag),
            pa["b2"].reshape(1, 1),
            po["enc_w1"], po["enc_b1"].reshape(1, oh),
            po["enc_w2"].reshape(1, oh), po["enc_b2"].reshape(1, 1),
            po["f_w1"], po["f_b1"].reshape(1, oh),
            po["f_w2"].reshape(1, oh), po["f_b2"].reshape(1, 1),
            po["sage1_wl"], po["sage1_bl"].reshape(1, oh), po["sage1_wr"],
            po["sage2_wl"].reshape(1, oh), po["sage2_bl"].reshape(1, 1),
            po["sage2_wr"].reshape(1, oh))
    args = tuple(a.astype(f32) for a in args)
    return pl.pallas_call(
        functools.partial(_core_kernel, dts=dts),
        out_shape=(jax.ShapeDtypeStruct((N, S), f32),        # assignment
                   jax.ShapeDtypeStruct((S, S), f32),        # backbone
                   jax.ShapeDtypeStruct((S, horizon), f32),  # Y_sup
                   jax.ShapeDtypeStruct((N, horizon), f32)),  # Y_coarse
        compiler_params=pltpu.CompilerParams(vmem_limit_bytes=_VMEM_LIMIT),
    )(*args)


def pallas_refiners(Xc, Yc, WX, BX, WY, BY, WO1A, WO1B, BO1, WO2, BO2):
    kk, nk, _ = Xc.shape
    H = Yc.shape[2]
    f32 = jnp.float32
    operands = tuple(o.astype(f32) for o in
                     (Xc, Yc, WX, BX, WY, BY, WO1A, WO1B, BO1, WO2, BO2))
    return pl.pallas_call(
        _refiner_kernel,
        out_shape=jax.ShapeDtypeStruct((kk, nk, H), f32),
        compiler_params=pltpu.CompilerParams(vmem_limit_bytes=_VMEM_LIMIT),
    )(*operands)


# ----------------------------- parameter init -----------------------------

def _linear_params(key, in_dim, out_dim, bias=True):
    kw, kb = jax.random.split(key)
    bound = 1.0 / math.sqrt(in_dim)
    w = jax.random.uniform(kw, (in_dim, out_dim), jnp.float32, -bound, bound)
    b = (jax.random.uniform(kb, (out_dim,), jnp.float32, -bound, bound)
         if bias else None)
    return w, b


def init_params(key, cfg):
    L, H = cfg["lookback"], cfg["horizon"]
    ag, oh, sr = cfg["ag_hid_dim"], cfg["ode_hid_dim"], cfg["sr_hid_dim"]
    keys = iter(jax.random.split(key, 64))
    p = {}
    # TopKPooling weight  (shape [1, lookback] in PyG)
    p["pool_w"] = jax.random.uniform(next(keys), (L,), jnp.float32, -1.0, 1.0)

    def repr_net(k):
        k1, k2, _ = jax.random.split(k, 3)
        w1, b1 = _linear_params(k1, 1, ag)
        w2, b2 = _linear_params(k2, ag, ag)
        return dict(w1=w1, b1=b1, w2=w2, b2=b2,
                    ln_g=jnp.ones((ag,), jnp.float32),
                    ln_b=jnp.zeros((ag,), jnp.float32))

    p["repr_x"] = repr_net(next(keys))
    p["repr_super"] = repr_net(next(keys))

    w1, b1 = _linear_params(next(keys), 1, ag)
    w2, b2 = _linear_params(next(keys), ag, 1)
    p["agc"] = dict(w1=w1, b1=b1, w2=w2, b2=b2)

    ew1, eb1 = _linear_params(next(keys), L, oh)
    ew2, eb2 = _linear_params(next(keys), oh, 1)
    fw1, fb1 = _linear_params(next(keys), 1, oh)
    fw2, fb2 = _linear_params(next(keys), oh, 1)
    s1wl, s1bl = _linear_params(next(keys), 1, oh)
    s1wr, _ = _linear_params(next(keys), 1, oh, bias=False)
    s2wl, s2bl = _linear_params(next(keys), oh, 1)
    s2wr, _ = _linear_params(next(keys), oh, 1, bias=False)
    p["ode"] = dict(enc_w1=ew1, enc_b1=eb1, enc_w2=ew2, enc_b2=eb2,
                    f_w1=fw1, f_b1=fb1, f_w2=fw2, f_b2=fb2,
                    sage1_wl=s1wl, sage1_bl=s1bl, sage1_wr=s1wr,
                    sage2_wl=s2wl, sage2_bl=s2bl, sage2_wr=s2wr)

    refiners = []
    for _ in range(cfg["k"]):
        kx, ky, ko1, ko2 = jax.random.split(next(keys), 4)
        wx, bx = _linear_params(kx, L * cfg["feature_dim"], sr)
        wy, by = _linear_params(ky, H * cfg["feature_dim"], sr)
        wo1, bo1 = _linear_params(ko1, 2 * sr, sr)
        wo2, bo2 = _linear_params(ko2, sr, H * cfg["feature_dim"])
        refiners.append(dict(wx=wx, bx=bx, wy=wy, by=by,
                             wo1=wo1, bo1=bo1, wo2=wo2, bo2=bo2))
    p["refiners"] = refiners
    return p


# ------------------------------- forward ----------------------------------

def _run_refiners(x, ycoarse_NH, cluster_node_indices, cluster_ptr,
                  refiner_params, cfg):
    N, L = x.shape
    H = cfg["horizon"]
    sr = cfg["sr_hid_dim"]
    pred = jnp.zeros((N, H), jnp.float32)

    n_clusters = len(cluster_ptr) - 1
    sizes = [int(cluster_ptr[i + 1]) - int(cluster_ptr[i])
             for i in range(n_clusters)]
    active = [i for i in range(n_clusters) if sizes[i] > 0]
    if not active:
        return pred
    nk_max = max(sizes[i] for i in active)

    # pad every cluster to nk_max -> a single batched, grid-less pallas_call;
    # padded rows are computed on dummy node 0 and sliced off before scatter.
    ids_list = []
    for i in active:
        s0 = int(cluster_ptr[i])
        nk = sizes[i]
        ids = cluster_node_indices[s0:s0 + nk]
        ids_list.append(jnp.pad(ids, (0, nk_max - nk)))
    ids_pad = jnp.stack(ids_list)                            # [kk, nk_max]

    Xc = x[ids_pad].astype(jnp.float32)                      # [kk, nk_max, L]
    Yc = ycoarse_NH[ids_pad]                                 # [kk, nk_max, H]
    ps = [refiner_params[i] for i in active]
    WX = jnp.stack([q["wx"] for q in ps])
    BX = jnp.stack([q["bx"].reshape(1, sr) for q in ps])
    WY = jnp.stack([q["wy"] for q in ps])
    BY = jnp.stack([q["by"].reshape(1, sr) for q in ps])
    WO1A = jnp.stack([q["wo1"][:sr] for q in ps])
    WO1B = jnp.stack([q["wo1"][sr:] for q in ps])
    BO1 = jnp.stack([q["bo1"].reshape(1, sr) for q in ps])
    WO2 = jnp.stack([q["wo2"] for q in ps])
    BO2 = jnp.stack([q["bo2"].reshape(1, H) for q in ps])

    out = pallas_refiners(Xc, Yc, WX, BX, WY, BY, WO1A, WO1B, BO1, WO2, BO2)

    for j, i in enumerate(active):
        s0 = int(cluster_ptr[i])
        nk = sizes[i]
        ids = cluster_node_indices[s0:s0 + nk]
        pred = pred.at[ids].set(out[j, :nk])
    return pred


def unigonet_sage_forward(params, x, edge_index, cluster_node_indices,
                          cluster_ptr, cfg):
    N, L = x.shape
    horizon = cfg["horizon"]
    S = cfg["num_supernodes"]
    x = x.astype(jnp.float32)

    # dense adjacency (adj[src, dst] = 1) + symmetrisation (same as torch);
    # adj itself is a required model output, so it has to be materialized.
    adj = jnp.zeros((N, N), jnp.float32).at[edge_index[0], edge_index[1]].set(1.0)
    adj = adj + adj.T
    # TODO(synk): at large N, derive degrees/colmean directly from edge_index
    # (scalar prefetch) instead of round-tripping the dense [N,N] array.

    # ---- K1: Laplacian product / pooling score / adj column mean ----
    agc_in, score_col, dmean = pallas_graph_prep(adj, x, params["pool_w"])

    # TopKPooling (pool_type == 'topk'); the selection itself is XLA (data dep.)
    topv, perm = jax.lax.top_k(score_col[:, 0], S)
    pooled_x = x[perm] * topv[:, None]                        # [S, L]

    # torch's raw `.reshape` of the contiguous permuted tensors (free in XLA):
    xq = x.T.reshape(N, L)
    pq = pooled_x.T.reshape(S, L)

    tspan = cfg["tspan"]
    dts = tuple(float(tspan[i + 1] - tspan[i]) for i in range(horizon - 1))

    # ---- K2: fused repr nets + agc + assignment + backbone + BackboneODE ----
    assignment, backbone, ysup_SH, ycoarse_NH = pallas_core(
        xq, pq, agc_in, dmean, params, dts, cfg)
    Y_supernode = ysup_SH.T[:, :, None]                       # [horizon, S, 1]

    # ---- K3: refiners (single batched call over padded clusters) ----
    pred = _run_refiners(x, ycoarse_NH, cluster_node_indices, cluster_ptr,
                         params["refiners"], cfg)              # [N, horizon]

    return pred, assignment, backbone, adj, Y_supernode


# ------------------------------- main --------------------------------------

if __name__ == "__main__":
    cfg = dict(
        feature_dim=1,     # repr nets apply Linear(feature_dim, .) to [..., 1]
        lookback=8,
        horizon=4,
        ag_hid_dim=16,
        ode_hid_dim=16,
        sr_hid_dim=16,
        pool_ratio=0.5,
        dt=0.1,
        k=2,               # model_args.k * batch_size
    )
    num_nodes = 16
    cfg["num_supernodes"] = math.ceil(cfg["pool_ratio"] * num_nodes)
    start_t = cfg["lookback"] * cfg["dt"]
    end_t = (cfg["lookback"] + cfg["horizon"] - 1) * cfg["dt"]
    if cfg["horizon"] > 1:
        step = (end_t - start_t) / (cfg["horizon"] - 1)
    else:
        step = 0.0
    cfg["tspan"] = [start_t + i * step for i in range(cfg["horizon"])]

    key = jax.random.PRNGKey(0)
    k_param, k_x, k_perm = jax.random.split(key, 3)

    params = init_params(k_param, cfg)

    # deterministic inputs
    x = jax.random.normal(k_x, (num_nodes, cfg["lookback"]), jnp.float32)
    # ring graph + a few chords (every node has degree >= 1 -> valid Laplacian)
    src = list(range(num_nodes)) + [0, 3, 5, 7]
    dst = [(i + 1) % num_nodes for i in range(num_nodes)] + [8, 11, 13, 15]
    edge_index = jnp.array([src, dst], dtype=jnp.int32)
    cluster_node_indices = jax.random.permutation(
        k_perm, jnp.arange(num_nodes, dtype=jnp.int32))
    cluster_ptr = [0, 8, 16]   # two clusters of 8 nodes

    pred, assignment, backbone, adj, Y_sup = unigonet_sage_forward(
        params, x, edge_index, cluster_node_indices, cluster_ptr, cfg)

    jax.block_until_ready(pred)
    assert pred.shape == (num_nodes, cfg["horizon"])
    assert assignment.shape == (num_nodes, cfg["num_supernodes"])
    assert backbone.shape == (cfg["num_supernodes"], cfg["num_supernodes"])
    assert Y_sup.shape == (cfg["horizon"], cfg["num_supernodes"], 1)
    assert bool(jnp.all(jnp.isfinite(pred)))
    assert bool(jnp.all(jnp.isfinite(assignment)))
    # softmax rows must sum to 1 (exact reciprocal, not approx)
    assert bool(jnp.allclose(jnp.sum(assignment, axis=-1), 1.0, atol=1e-5))
    print("KERNEL_OK")
</pallas_src>

<mosaic_0001>
module attributes {stable_mosaic.version = 11 : i64} {
  func.func @_graph_prep_kernel(%arg0: memref<16x16xf32, #tpu.memory_space<vmem>>, %arg1: memref<16x8xf32, #tpu.memory_space<vmem>>, %arg2: memref<1x8xf32, #tpu.memory_space<vmem>>, %arg3: memref<16x8xf32, #tpu.memory_space<vmem>>, %arg4: memref<16x1xf32, #tpu.memory_space<vmem>>, %arg5: memref<16x1xf32, #tpu.memory_space<vmem>>) attributes {dimension_semantics = [], scalar_prefetch = 0 : i64, scratch_operands = 0 : i64, tpu.core_type = #tpu.core_type<tc>} {
    %c0 = arith.constant 0 : index
    %c0_0 = arith.constant 0 : index
    %0 = vector.load %arg0[%c0, %c0_0] : memref<16x16xf32, #tpu.memory_space<vmem>>, vector<16x16xf32>
    %c0_1 = arith.constant 0 : index
    %c0_2 = arith.constant 0 : index
    %1 = vector.load %arg1[%c0_1, %c0_2] : memref<16x8xf32, #tpu.memory_space<vmem>>, vector<16x8xf32>
    %cst = arith.constant dense<0.000000e+00> : vector<16xf32>
    %2 = vector.multi_reduction <add>, %0, %cst [1] : vector<16x16xf32> to vector<16xf32>
    %3 = vector.shape_cast %2 : vector<16xf32> to vector<16x1xf32>
    %cst_3 = arith.constant 0.000000e+00 : f32
    %4 = vector.broadcast %cst_3 : f32 to vector<16x1xf32>
    %5 = arith.cmpf ogt, %3, %4 : vector<16x1xf32>
    %cst_4 = arith.constant 1.000000e-30 : f32
    %6 = vector.broadcast %cst_4 : f32 to vector<16x1xf32>
    %7 = arith.maximumf %3, %6 : vector<16x1xf32>
    %8 = math.rsqrt %7 : vector<16x1xf32>
    %cst_5 = arith.constant 0.000000e+00 : f32
    %9 = vector.broadcast %cst_5 : f32 to vector<16x1xf32>
    %10 = arith.select %5, %8, %9 : vector<16x1xi1>, vector<16x1xf32>
    %cst_6 = arith.constant 6.250000e-02 : f32
    %11 = vector.broadcast %cst_6 : f32 to vector<16x1xf32>
    %12 = arith.mulf %3, %11 : vector<16x1xf32>
    %c0_7 = arith.constant 0 : index
    %c0_8 = arith.constant 0 : index
    %13 = vector.load %arg5[%c0_7, %c0_8] : memref<16x1xf32, #tpu.memory_space<vmem>>, vector<16x1xf32>
    tpu.vector_store %arg5[%c0_7, %c0_8], %12 {strides = array<i32>} : memref<16x1xf32, #tpu.memory_space<vmem>>, vector<16x1xf32>,
    %c0_9 = arith.constant 0 : index
    %c0_10 = arith.constant 0 : index
    %14 = vector.load %arg2[%c0_9, %c0_10] : memref<1x8xf32, #tpu.memory_space<vmem>>, vector<1x8xf32>
    %15 = arith.mulf %14, %14 : vector<1x8xf32>
    %16 = vector.shape_cast %15 : vector<1x8xf32> to vector<1x1x8xf32>
    %cst_11 = arith.constant dense<0.000000e+00> : vector<1xf32>
    %17 = vector.multi_reduction <add>, %16, %cst_11 [1, 2] : vector<1x1x8xf32> to vector<1xf32>
    %18 = vector.shape_cast %17 : vector<1xf32> to vector<1x1x1xf32>
    %19 = vector.extract %18[0, 0, 0] : f32 from vector<1x1x1xf32>
    %20 = math.rsqrt %19 : f32
    %21 = vector.broadcast %14 : vector<1x8xf32> to vector<16x8xf32>
    %22 = arith.mulf %1, %21 : vector<16x8xf32>
    %cst_12 = arith.constant dense<0.000000e+00> : vector<16xf32>
    %23 = vector.multi_reduction <add>, %22, %cst_12 [1] : vector<16x8xf32> to vector<16xf32>
    %24 = vector.shape_cast %23 : vector<16xf32> to vector<16x1xf32>
    %25 = vector.broadcast %20 : f32 to vector<16x1xf32>
    %26 = arith.mulf %24, %25 : vector<16x1xf32>
    %27 = math.tanh %26 : vector<16x1xf32>
    %c0_13 = arith.constant 0 : index
    %c0_14 = arith.constant 0 : index
    %28 = vector.load %arg4[%c0_13, %c0_14] : memref<16x1xf32, #tpu.memory_space<vmem>>, vector<16x1xf32>
    tpu.vector_store %arg4[%c0_13, %c0_14], %27 {strides = array<i32>} : memref<16x1xf32, #tpu.memory_space<vmem>>, vector<16x1xf32>,
    %29 = vector.broadcast %10 : vector<16x1xf32> to vector<16x8xf32>
    %30 = arith.mulf %29, %1 : vector<16x8xf32>
    %cst_15 = arith.constant dense<0.000000e+00> : vector<16x8xf32>
    %31 = tpu.matmul %0, %30, %cst_15 {dimension_numbers = #tpu.dot_dimension_numbers<[1], [0], [0], [1], [0, 0, 1, 1], [], []>} : vector<16x16xf32>, vector<16x8xf32>, vector<16x8xf32> -> vector<16x8xf32>
    %32 = vector.broadcast %10 : vector<16x1xf32> to vector<16x8xf32>
    %33 = arith.mulf %32, %31 : vector<16x8xf32>
    %34 = arith.subf %1, %33 : vector<16x8xf32>
    %c0_16 = arith.constant 0 : index
    %c0_17 = arith.constant 0 : index
    %35 = vector.load %arg3[%c0_16, %c0_17] : memref<16x8xf32, #tpu.memory_space<vmem>>, vector<16x8xf32>
    tpu.vector_store %arg3[%c0_16, %c0_17], %34 {strides = array<i32>} : memref<16x8xf32, #tpu.memory_space<vmem>>, vector<16x8xf32>,
    return
  }
}

</mosaic_0001>

<bundles_post_ra>
// kernel: tpu_custom_call.1
= control target key start
LH: loop header
LB: loop body
LE: loop exit
PB: predicated region body
PF: predicated region fallthrough
CT: control target
= control target key end

     0   :  { %vm21_vm0 = vcmask 130048   ;;  %vm43_vm1 = vcmask 57344   ;;  %v58_v7 = vlaneseq  ;;  %vm65_vm2 = vcmask 64512   ;;  %s292_s0 = inlined_call_operand.vmem [shape: f32[16,16], index: 0, kind: input, shape index: {}]   ;;  %s293_s2 = inlined_call_operand.vmem [shape: f32[1,8], index: 2, kind: input, shape index: {}]   ;;  %s294_s1 = inlined_call_operand.vmem [shape: f32[16,8], index: 1, kind: input, shape index: {}]   ;;  %s295_s5 = inlined_call_operand.vmem [shape: f32[16,1], index: 5, kind: output, shape index: {2}]   ;;  %s296_s4 = inlined_call_operand.vmem [shape: f32[16,1], index: 4, kind: output, shape index: {1}]   ;;  %s297_s3 = inlined_call_operand.vmem [shape: f32[16,8], index: 3, kind: output, shape index: {0}]  }
   0x1   :  { %v18_v0 = vld [vmem:[%s292_s0 + $0x8] sm:$0xff]  ;;  %v17_v1 = vld [vmem:[%s292_s0] sm:$0xff]  ;;  %vm38_vm3 = vcmask 7168  }
   0x2   :  { %v41_v2 = vld [vmem:[%s293_s2] sm:$0x1]  ;;  %v25_v3 = vsel %vm21_vm0, %v18_v0, 0.0  ;;  %190 = vmatprep.mubr.msk.f32.mxu0 %vm21_vm0, %v17_v1  ;;  %v22_v5 = vsel %vm21_vm0, %v17_v1, 0.0  ;;  %v59_v8 = vshrl.u32 %v58_v7, 7  ;;  %v257_v12 = vld [vmem:[%s294_s1 + $0x8] sm:$0xff] }
   0x3   :  { %v42_v4 = vmul.f32 %v41_v2, %v41_v2  ;;  %26 = vadd.xlane.f32.xlu0 %v25_v3  ;;  %v252_v11 = vld [vmem:[%s294_s1] sm:$0xff] }
   0x4   :  { %v60_v9 = vsub.s32 0, %v59_v8 }
   0x5   :  { %v44_v6 = vsel %vm43_vm1, %v42_v4, 0.0 }
   0x6   :  { %45 = vadd.xlane.f32.xlu1 %v44_v6  ;;  %v61_v10 = vrot.slane %v41_v2, %v60_v9 }
   0x7   :  { %23 = vadd.xlane.f32.xlu0 %v22_v5 }
   0x8   :  { %v63_v13 = vmul.f32 %v61_v10, %v252_v11  ;;  %v64_v14 = vmul.f32 %v61_v10, %v257_v12 }
   0xa   :  { %v66_v15 = vsel %vm65_vm2, %v63_v13, 0.0  ;;  %v69_v16 = vsel %vm65_vm2, %v64_v14, 0.0 }
   0xb   :  { %67 = vadd.xlane.f32.xlu1 %v66_v15  ;;  %70 = vadd.xlane.f32.xlu0 %v69_v16 }
  0x8c   :  { %v27_v17 = vpop.xlane.xlu0 %26 }
  0x8d   :  { %v31_v18 = vmax.f32 %v27_v17, 1e-30  ;;  %v37_v19 = vmul.f32 0.0625, %v27_v17  ;;  %vm29_vm4 = vcmp.gt.f32.partialorder %v27_v17, 0.0 }
  0x8f   :  { %v46_v20 = vpop.xlane.xlu1 %45  ;;  %197 = vrsqrt.f32 %v31_v18  ;;  %40 = vst.msk [vmem:[%s295_s5 + $0x8] sm:$0xff] %vm38_vm3, %v37_v19 }
  0x90   :  { %v47_v21 = vrot.slane %v46_v20, 4  ;;  %v24_v22 = vpop.xlane.xlu0 %23 }
  0x91   :  { %v30_v23 = vmax.f32 %v24_v22, 1e-30  ;;  %v36_v24 = vmul.f32 0.0625, %v24_v22  ;;  %vm28_vm5 = vcmp.gt.f32.partialorder %v24_v22, 0.0 }
  0x92   :  { %v48_v25 = vadd.f32 %v47_v21, %v46_v20 }
  0x93   :  { %199 = vrsqrt.f32 %v30_v23  ;;  %39 = vst.msk [vmem:[%s295_s5] sm:$0xff] %vm38_vm3, %v36_v24 }
  0x94   :  { %v49_v26 = vrot.slane %v48_v25, 2  ;;  %v68_v38 = vpop.xlane.xlu1 %67  ;;  %v71_v39 = vpop.xlane.xlu0 %70 }
  0x96   :  { %v50_v27 = vadd.f32 %v49_v26, %v48_v25 }
  0x98   :  { %v51_v28 = vrot.slane %v50_v27, 1 }
  0x9a   :  { %v52_v29 = vadd.f32 %v51_v28, %v50_v27 }
  0x9c   :  { %193 = vpush %v52_v29  ;;  %v198_v30 = vpop.eup %197 }
  0x9d   :  { %v35_v31 = vsel %vm29_vm4, %v198_v30, 0.0 }
  0x9e   :  { %v80_v32 = vmul.f32 %v35_v31, %v257_v12 }
  0xa0   :  { %v200_v33 = vpop.eup %199  ;;  %186 = vmatprep.subr.mxu0 %v80_v32 }
  0xa1   :  { %v34_v34 = vsel %vm28_vm5, %v200_v33, 0.0  ;;  %187 = vmatpush3.msra.mxu0 %v80_v32 }
  0xa2   :  { %v79_v35 = vmul.f32 %v34_v34, %v252_v11 }
  0xa4   :  { %188 = vmatprep.subr.mxu0 %v79_v35 }
  0xa5   :  { %189 = vmatpush3.msra.mxu0 %v79_v35 }
  0xa6   :  { %191 = vmatmul.mubr.msk.f32.vlgmr.msra.gmra.mxu0 %vm21_vm0, %v18_v0 }
  0xcd   :  { %s194_s5 = spop %193 }
  0xce   :  { %v54_v36 = vstv %s194_s5 }
  0xcf   :  { %201 = vrsqrt.f32 %v54_v36 }
  0xdc   :  { %v202_v37 = vpop.eup %201 }
  0xdd   :  { %195 = vpush %v202_v37 }
 0x10e   :  { %s196_s29 = spop %195 }
 0x10f   :  { %v72_v40 = vstv %s196_s29 }
 0x110   :  { %v73_v41 = vmul.f32 %v72_v40, %v68_v38  ;;  %v74_v42 = vmul.f32 %v72_v40, %v71_v39 }
 0x112   :  { %203 = vtanh.f32 %v73_v41 }
 0x113   :  { %205 = vtanh.f32 %v74_v42 }
 0x11f   :  { %v204_v43 = vpop.eup %203 }
 0x120   :  { %v206_v44 = vpop.eup %205  ;;  %77 = vst.msk [vmem:[%s296_s4] sm:$0xff] %vm38_vm3, %v204_v43 }
 0x121   :  { %78 = vst.msk [vmem:[%s296_s4 + $0x8] sm:$0xff] %vm38_vm3, %v206_v44 }
 0x166   :  { %v192_v45 = vpop.f32.mrf.mxu0 }
 0x167   :  { %v163_v46 = vmul.f32 %v192_v45, %v35_v31 }
 0x168   :  { %v153_v47 = vpop.f32.mrf.mxu0 }
 0x169   :  { %v165_v48 = vsub.f32 %v257_v12, %v163_v46  ;;  %v162_v49 = vmul.f32 %v153_v47, %v34_v34 }
 0x16b   :  { %167 = vst.msk [vmem:[%s297_s3 + $0x8] sm:$0xff] %vm65_vm2, %v165_v48  ;;  %v164_v50 = vsub.f32 %v252_v11, %v162_v49 }
 0x16d   :  { %166 = vst.msk [vmem:[%s297_s3] sm:$0xff] %vm65_vm2, %v164_v50 }

</bundles_post_ra>
